<compile_context>
chip_gen: v7x
topology: tpu7x:2x2x1
jax: 0.10.0
libtpu: 0.0.40
codegen_flags: <defaults>
</compile_context>

<pallas_src>
import functools

import jax
import jax.numpy as jnp
import numpy as np
from jax.experimental import pallas as pl
from jax.experimental.pallas import tpu as pltpu

_EPS = 1e-05
# Total footprint target for the double-buffered input pipeline
# (n_streams x 2 buffers x padded block).  8 MiB stays safely inside v5e's
# 16 MiB scoped-VMEM default and leaves lots of headroom on v6e/v7x.
_PIPELINE_BYTES_BUDGET = 8 * 1024 * 1024
# Explicit scoped-VMEM limit: generous for in-kernel temporaries, but with
# clear headroom under v7x's 64 MiB physical VMEM.
_VMEM_LIMIT_BYTES = 40 * 1024 * 1024
# Soft cap on the folded lane width so one block row stays modest.
_MAX_FOLDED_LANES = 8192


def _pick_fold(H, W):
    """Lane-fold factor k: (B,C,H,W) -> (B,C,H//k,k*W) so the lane axis is
    dense (>= 128 lanes) when W is small.  k must divide H; the reshape is a
    free, contiguous HBM reshape."""
    if W >= 128 or H <= 1:
        return 1
    k0 = -(-128 // W)                       # ceil(128 / W)
    divisors = [d for d in range(1, H + 1) if H % d == 0]
    full_lane = [d for d in divisors if d >= k0 and d * W <= _MAX_FOLDED_LANES]
    if full_lane:
        return min(full_lane)               # smallest fold reaching >=128 lanes
    under = [d for d in divisors if d * W <= _MAX_FOLDED_LANES]
    return max(under) if under else 1


def _pick_h_tile(Hf, C, Wf, itemsize, sub, n_streams):
    """h-tile (rows of the folded H axis) budgeted against the *padded* VMEM
    tile (lanes rounded to 128, dtype sublane tile `sub`).  Returns
    (h_tile, padded_Hf); padded_Hf > Hf means the caller must zero-pad."""
    lanes_padded = -(-Wf // 128) * 128
    bytes_per_row = max(1, C * lanes_padded * itemsize)
    per_block = max(1, _PIPELINE_BYTES_BUDGET // (2 * n_streams))
    max_rows = max(1, per_block // bytes_per_row)
    if Hf <= max_rows:
        return Hf, Hf                        # whole (folded) H fits in one block
    t = (max_rows // sub) * sub
    while t >= sub:
        if Hf % t == 0:
            return t, Hf
        t -= sub
    # No sublane-aligned divisor of Hf fits the budget: zero-pad Hf up to a
    # multiple of the largest aligned tile that does fit.  Zero rows add
    # nothing to any accumulated sum, so this is correctness-safe and keeps
    # the real VMEM footprint bounded (review correctness concern).
    t = max(sub, (max_rows // sub) * sub)
    return t, -(-Hf // t) * t


def _elementwise_dtype(*dtypes):
    """Dtype for the in-kernel elementwise stage: keep bf16/f16 packed
    (halves VALU work on v6e/v7x), promote everything else to f32."""
    dt = jnp.result_type(*dtypes)
    if dt == jnp.bfloat16 or dt == jnp.float16:
        return dt
    return jnp.float32


def _partial_reduce(x, acc_rows):
    """(1, C, ht, Wf) -> (1, 1, acc_rows, Wf) float32 partial sums.

    With acc_rows == 8 the C and ht/8 vreg groups are summed with plain VPU
    adds only; the final 8 -> 1 cross-sublane (XLU) reduce is deferred to the
    tiny JAX epilogue, so no XLU reduce runs per grid step."""
    _, C, ht, Wf = x.shape
    xf = x.astype(jnp.float32)
    if acc_rows == 1:
        s = jnp.sum(xf, axis=(1, 2))                                    # (1, Wf)
    else:
        s = jnp.sum(xf.reshape(C, ht // acc_rows, acc_rows, Wf), axis=(0, 1))
    return s.reshape(1, 1, acc_rows, Wf)


def _unweighted_sums_kernel(p_ref, t_ref, sps_ref, spt_ref, *,
                            ew_dtype, acc_rows):
    """Weights constant over (C, H): only sum(p+t) and sum(p*t) are needed;
    the weight is applied analytically in the epilogue."""
    h = pl.program_id(2)

    @pl.when(h == 0)
    def _init():
        sps_ref[...] = jnp.zeros_like(sps_ref)
        spt_ref[...] = jnp.zeros_like(spt_ref)

    p = p_ref[...].astype(ew_dtype)           # (1, C, ht, Wf)
    t = t_ref[...].astype(ew_dtype)
    sps_ref[...] += _partial_reduce(p + t, acc_rows)
    spt_ref[...] += _partial_reduce(p * t, acc_rows)


def _weighted_sums_kernel(p_ref, t_ref, w_ref, sw_ref, sps_ref, spt_ref, *,
                          ew_dtype, acc_rows):
    """Per-pixel weights: three sums sum(w), sum((p+t)w), sum(p*t*w)."""
    h = pl.program_id(2)

    @pl.when(h == 0)
    def _init():
        sw_ref[...] = jnp.zeros_like(sw_ref)
        sps_ref[...] = jnp.zeros_like(sps_ref)
        spt_ref[...] = jnp.zeros_like(spt_ref)

    p = p_ref[...].astype(ew_dtype)
    t = t_ref[...].astype(ew_dtype)
    w = w_ref[...].astype(ew_dtype)
    sw_ref[...] += _partial_reduce(w, acc_rows)
    sps_ref[...] += _partial_reduce((p + t) * w, acc_rows)
    spt_ref[...] += _partial_reduce((p * t) * w, acc_rows)


def _finish(raw, B, k, W):
    """(B, P, acc_rows, Wf) raw partials -> (B, W): combine megacore partials
    + sublane partials, then fold the k lane sub-groups per output column."""
    s = jnp.sum(raw, axis=(1, 2))                        # (B, Wf)
    return jnp.sum(s.reshape(B, k, W), axis=1)           # (B, W)


def _iou_from_sums(Sps, Spt, Sw):
    """Bi-class soft Jaccard from Sps=sum((p+t)w), Spt=sum(p*t*w), Sw=sum(w)."""
    eps = jnp.float32(_EPS)
    iou1 = (eps + Spt) / (eps + (Sps - Spt))               # I1 / U1
    iou2 = (eps + (Sw - Sps + Spt)) / (eps + (Sw - Spt))   # I2 / U2
    return 0.5 * (iou1 + iou2)


def soft_jaccard_instance_biclass_coef(y_pred, y_true, pixel_weights=1,
                                       h_tile=None, fold=None):
    """Pallas equivalent of SoftJaccardInstanceBiclassCoef.forward.

    y_pred, y_true: (B, C, H, W).  pixel_weights: scalar (default 1) or an
    array broadcastable to (B, C, H, W).  Returns float32 (B, W), matching the
    PyTorch sum(dim=(1, 2)) on a 4-D NCHW tensor."""
    y_pred = jnp.asarray(y_pred)
    y_true = jnp.asarray(y_true)
    assert y_pred.ndim == 4 and y_true.shape == y_pred.shape
    B, C, H, W = y_pred.shape

    w = jnp.asarray(pixel_weights)
    assert w.ndim <= 4
    w4 = w.reshape((1,) * (4 - w.ndim) + tuple(w.shape))
    for d, full in zip(w4.shape, (B, C, H, W)):
        assert d in (1, full), (w4.shape, (B, C, H, W))
    # Weights constant over C and H factor out of the (C, H) reduction.
    factorizable = (w4.shape[1] == 1 and w4.shape[2] == 1)

    # Lane-dense fold of H into the lane axis (free, contiguous reshape).
    k = _pick_fold(H, W) if fold is None else int(fold)
    assert H % k == 0, (H, k)
    Hf, Wf = H // k, k * W

    streams = [y_pred, y_true]
    if not factorizable:
        # TODO(synk): per-channel / per-(H,W) lower-rank weights are still
        # materialized into a full third HBM stream; a small VMEM/SMEM
        # broadcast path inside the kernel would remove that traffic.
        streams.append(jnp.broadcast_to(w4, (B, C, H, W)))

    ew_dtype = _elementwise_dtype(*[s.dtype for s in streams])
    itemsize = max(s.dtype.itemsize for s in streams)
    sub = max(max(8, 32 // s.dtype.itemsize) for s in streams)

    if h_tile is None:
        ht, Hp = _pick_h_tile(Hf, C, Wf, itemsize, sub, len(streams))
    else:
        ht = int(h_tile)
        assert Hf % ht == 0 and (ht % sub == 0 or ht == Hf), (Hf, ht, sub)
        Hp = Hf

    def prep(x):
        x = x.reshape(B, C, Hf, Wf)
        if Hp != Hf:
            x = jnp.pad(x, ((0, 0), (0, 0), (0, Hp - Hf), (0, 0)))
        return x

    streams = [prep(s) for s in streams]

    n_h = Hp // ht
    # Keep both v7x TensorCores busy when B == 1 by splitting the reduction
    # into 2 parallel partitions (partials combined in the epilogue).
    P = 2 if (B == 1 and n_h >= 2 and n_h % 2 == 0) else 1
    n_hp = n_h // P
    acc_rows = 8 if ht % 8 == 0 else 1

    grid = (B, P, n_hp)
    in_block = pl.BlockSpec((1, C, ht, Wf),
                            lambda b, p, h: (b, 0, p * n_hp + h, 0))
    out_block = pl.BlockSpec((1, 1, acc_rows, Wf), lambda b, p, h: (b, p, 0, 0))
    raw_shape = jax.ShapeDtypeStruct((B, P, acc_rows, Wf), jnp.float32)
    compiler_params = pltpu.CompilerParams(
        dimension_semantics=("parallel", "parallel", "arbitrary"),
        vmem_limit_bytes=_VMEM_LIMIT_BYTES)

    if factorizable:
        kernel = functools.partial(_unweighted_sums_kernel,
                                   ew_dtype=ew_dtype, acc_rows=acc_rows)
        sps_raw, spt_raw = pl.pallas_call(
            kernel,
            out_shape=(raw_shape, raw_shape),
            grid=grid,
            in_specs=[in_block, in_block],
            out_specs=(out_block, out_block),
            compiler_params=compiler_params,
        )(*streams)
        w_bw = jnp.broadcast_to(w4[:, 0, 0, :].astype(jnp.float32), (B, W))
        Sps = _finish(sps_raw, B, k, W) * w_bw
        Spt = _finish(spt_raw, B, k, W) * w_bw
        Sw = w_bw * jnp.float32(C * H)
    else:
        kernel = functools.partial(_weighted_sums_kernel,
                                   ew_dtype=ew_dtype, acc_rows=acc_rows)
        sw_raw, sps_raw, spt_raw = pl.pallas_call(
            kernel,
            out_shape=(raw_shape, raw_shape, raw_shape),
            grid=grid,
            in_specs=[in_block, in_block, in_block],
            out_specs=(out_block, out_block, out_block),
            compiler_params=compiler_params,
        )(*streams)
        Sw = _finish(sw_raw, B, k, W)
        Sps = _finish(sps_raw, B, k, W)
        Spt = _finish(spt_raw, B, k, W)

    return _iou_from_sums(Sps, Spt, Sw)


def _reference(y_pred, y_true, pixel_weights=1.0):
    # Pure-JAX transcription of the PyTorch forward, for verification.
    yp = jnp.asarray(y_pred, jnp.float32)
    yt = jnp.asarray(y_true, jnp.float32)
    pw = jnp.asarray(pixel_weights, jnp.float32)
    I1 = (yp * yt * pw).sum(axis=(1, 2))
    U1 = (yp * pw).sum(axis=(1, 2)) + (yt * pw).sum(axis=(1, 2)) - I1
    IoU1 = (1e-05 + I1) / (1e-05 + U1)
    I2 = ((1.0 - yp) * (1.0 - yt) * pw).sum(axis=(1, 2))
    U2 = (((1.0 - yp) * pw).sum(axis=(1, 2))
          + ((1.0 - yt) * pw).sum(axis=(1, 2)) - I2)
    IoU2 = (1e-05 + I2) / (1e-05 + U2)
    return (IoU1 + IoU2) / 2.0


if __name__ == "__main__":
    key = jax.random.PRNGKey(0)
    k1, k2, k3, k4, k5, k6, k7 = jax.random.split(key, 7)

    # Small NCHW shape consistent with the module.  W=16 exercises the
    # lane-dense fold (k=8 -> folded width 128).
    B, C, H, W = 2, 4, 16, 16
    y_pred = jax.nn.sigmoid(jax.random.normal(k1, (B, C, H, W), jnp.float32))
    y_true = (jax.random.uniform(k2, (B, C, H, W)) > 0.5).astype(jnp.float32)
    pixel_w = jax.random.uniform(k3, (B, C, H, W), dtype=jnp.float32,
                                 minval=0.5, maxval=1.5)

    # 1) Default scalar weights (pixel_weights=1) -> 2-stream unweighted path.
    out_s = soft_jaccard_instance_biclass_coef(y_pred, y_true)
    jax.block_until_ready(out_s)
    assert out_s.shape == (B, W)
    np.testing.assert_allclose(np.asarray(out_s),
                               np.asarray(_reference(y_pred, y_true, 1.0)),
                               rtol=2e-5, atol=2e-5)

    # 2) Non-unit scalar weight (still factorizable -> no weight HBM stream).
    out_s2 = soft_jaccard_instance_biclass_coef(y_pred, y_true, 0.75)
    jax.block_until_ready(out_s2)
    np.testing.assert_allclose(np.asarray(out_s2),
                               np.asarray(_reference(y_pred, y_true, 0.75)),
                               rtol=2e-5, atol=2e-5)

    # 3) Per-column (B,1,1,W) weights: constant over (C,H) -> factorizable
    #    path, weight applied in the epilogue, no third HBM stream.
    pw_col = jax.random.uniform(k6, (B, 1, 1, W), dtype=jnp.float32,
                                minval=0.5, maxval=1.5)
    out_c = soft_jaccard_instance_biclass_coef(y_pred, y_true, pw_col)
    jax.block_until_ready(out_c)
    np.testing.assert_allclose(np.asarray(out_c),
                               np.asarray(_reference(y_pred, y_true, pw_col)),
                               rtol=2e-5, atol=2e-5)

    # 4) Full per-pixel weights -> 3-stream weighted kernel.
    out_t = soft_jaccard_instance_biclass_coef(y_pred, y_true, pixel_w)
    jax.block_until_ready(out_t)
    assert out_t.shape == (B, W)
    np.testing.assert_allclose(np.asarray(out_t),
                               np.asarray(_reference(y_pred, y_true, pixel_w)),
                               rtol=2e-5, atol=2e-5)

    # 5) B=1 with multi-tile H: exercises the P=2 megacore split, multi-step
    #    accumulation and the sublane-partial (acc_rows=8) path.
    B2, C2, H2, W2 = 1, 2, 256, 32
    yp2 = jax.nn.sigmoid(jax.random.normal(k4, (B2, C2, H2, W2), jnp.float32))
    yt2 = (jax.random.uniform(k5, (B2, C2, H2, W2)) > 0.5).astype(jnp.float32)
    out_m = soft_jaccard_instance_biclass_coef(yp2, yt2, fold=4, h_tile=16)
    jax.block_until_ready(out_m)
    assert out_m.shape == (B2, W2)
    np.testing.assert_allclose(np.asarray(out_m),
                               np.asarray(_reference(yp2, yt2, 1.0)),
                               rtol=2e-5, atol=2e-5)

    # 6) bf16 inputs: packed-bf16 elementwise stage with f32 accumulation.
    B3, C3, H3, W3 = 2, 2, 64, 32
    yp3 = jax.nn.sigmoid(jax.random.normal(k7, (B3, C3, H3, W3),
                                           jnp.float32)).astype(jnp.bfloat16)
    yt3 = (jax.random.uniform(k2, (B3, C3, H3, W3)) > 0.5).astype(jnp.bfloat16)
    out_b = soft_jaccard_instance_biclass_coef(yp3, yt3)
    jax.block_until_ready(out_b)
    np.testing.assert_allclose(np.asarray(out_b),
                               np.asarray(_reference(yp3, yt3, 1.0)),
                               rtol=1e-2, atol=1e-2)

    print("KERNEL_OK")
</pallas_src>

<mosaic_0001>
module attributes {stable_mosaic.version = 11 : i64} {
  func.func @_unweighted_sums_kernel(%arg0: i32, %arg1: i32, %arg2: i32, %arg3: memref<1x4x2x128xf32, #tpu.memory_space<vmem>>, %arg4: memref<1x4x2x128xf32, #tpu.memory_space<vmem>>, %arg5: memref<1x1x1x128xf32, #tpu.memory_space<vmem>>, %arg6: memref<1x1x1x128xf32, #tpu.memory_space<vmem>>) attributes {dimension_semantics = [#tpu.dimension_semantics<parallel>, #tpu.dimension_semantics<parallel>, #tpu.dimension_semantics<arbitrary>], iteration_bounds = array<i64: 2, 1, 1>, scalar_prefetch = 0 : i64, scratch_operands = 0 : i64, tpu.core_type = #tpu.core_type<tc>, window_params = [{transform_indices = @transform_0, window_bounds = array<i64: 1, 4, 2, 128>}, {transform_indices = @transform_1, window_bounds = array<i64: 1, 4, 2, 128>}, {transform_indices = @transform_2, window_bounds = array<i64: 1, 1, 1, 128>}, {transform_indices = @transform_3, window_bounds = array<i64: 1, 1, 1, 128>}]} {
    %c0_i32 = arith.constant 0 : i32
    %0 = arith.cmpi eq, %arg2, %c0_i32 : i32
    %1 = arith.extui %0 : i1 to i32
    %c0_i32_0 = arith.constant 0 : i32
    %2 = arith.cmpi ne, %1, %c0_i32_0 : i32
    scf.if %2 {
      %cst_25 = arith.constant 0.000000e+00 : f32
      %17 = vector.broadcast %cst_25 : f32 to vector<1x1x1x128xf32>
      %c0_26 = arith.constant 0 : index
      %c0_27 = arith.constant 0 : index
      %c0_28 = arith.constant 0 : index
      %c0_29 = arith.constant 0 : index
      %18 = vector.load %arg5[%c0_26, %c0_27, %c0_28, %c0_29] : memref<1x1x1x128xf32, #tpu.memory_space<vmem>>, vector<1x1x1x128xf32>
      tpu.vector_store %arg5[%c0_26, %c0_27, %c0_28, %c0_29], %17 {strides = array<i32>} : memref<1x1x1x128xf32, #tpu.memory_space<vmem>>, vector<1x1x1x128xf32>,
      %cst_30 = arith.constant 0.000000e+00 : f32
      %19 = vector.broadcast %cst_30 : f32 to vector<1x1x1x128xf32>
      %c0_31 = arith.constant 0 : index
      %c0_32 = arith.constant 0 : index
      %c0_33 = arith.constant 0 : index
      %c0_34 = arith.constant 0 : index
      %20 = vector.load %arg6[%c0_31, %c0_32, %c0_33, %c0_34] : memref<1x1x1x128xf32, #tpu.memory_space<vmem>>, vector<1x1x1x128xf32>
      tpu.vector_store %arg6[%c0_31, %c0_32, %c0_33, %c0_34], %19 {strides = array<i32>} : memref<1x1x1x128xf32, #tpu.memory_space<vmem>>, vector<1x1x1x128xf32>,
    } else {
    }
    %c0 = arith.constant 0 : index
    %c0_1 = arith.constant 0 : index
    %c0_2 = arith.constant 0 : index
    %c0_3 = arith.constant 0 : index
    %3 = vector.load %arg3[%c0, %c0_1, %c0_2, %c0_3] : memref<1x4x2x128xf32, #tpu.memory_space<vmem>>, vector<1x4x2x128xf32>
    %c0_4 = arith.constant 0 : index
    %c0_5 = arith.constant 0 : index
    %c0_6 = arith.constant 0 : index
    %c0_7 = arith.constant 0 : index
    %4 = vector.load %arg4[%c0_4, %c0_5, %c0_6, %c0_7] : memref<1x4x2x128xf32, #tpu.memory_space<vmem>>, vector<1x4x2x128xf32>
    %c0_8 = arith.constant 0 : index
    %c0_9 = arith.constant 0 : index
    %c0_10 = arith.constant 0 : index
    %c0_11 = arith.constant 0 : index
    %5 = vector.load %arg5[%c0_8, %c0_9, %c0_10, %c0_11] : memref<1x1x1x128xf32, #tpu.memory_space<vmem>>, vector<1x1x1x128xf32>
    %6 = arith.addf %3, %4 : vector<1x4x2x128xf32>
    %cst = arith.constant dense<0.000000e+00> : vector<1x128xf32>
    %7 = vector.multi_reduction <add>, %6, %cst [1, 2] : vector<1x4x2x128xf32> to vector<1x128xf32>
    %8 = vector.shape_cast %7 : vector<1x128xf32> to vector<1x1x1x128xf32>
    %9 = arith.addf %5, %8 : vector<1x1x1x128xf32>
    %c0_12 = arith.constant 0 : index
    %c0_13 = arith.constant 0 : index
    %c0_14 = arith.constant 0 : index
    %c0_15 = arith.constant 0 : index
    %10 = vector.load %arg5[%c0_12, %c0_13, %c0_14, %c0_15] : memref<1x1x1x128xf32, #tpu.memory_space<vmem>>, vector<1x1x1x128xf32>
    tpu.vector_store %arg5[%c0_12, %c0_13, %c0_14, %c0_15], %9 {strides = array<i32>} : memref<1x1x1x128xf32, #tpu.memory_space<vmem>>, vector<1x1x1x128xf32>,
    %c0_16 = arith.constant 0 : index
    %c0_17 = arith.constant 0 : index
    %c0_18 = arith.constant 0 : index
    %c0_19 = arith.constant 0 : index
    %11 = vector.load %arg6[%c0_16, %c0_17, %c0_18, %c0_19] : memref<1x1x1x128xf32, #tpu.memory_space<vmem>>, vector<1x1x1x128xf32>
    %12 = arith.mulf %3, %4 : vector<1x4x2x128xf32>
    %cst_20 = arith.constant dense<0.000000e+00> : vector<1x128xf32>
    %13 = vector.multi_reduction <add>, %12, %cst_20 [1, 2] : vector<1x4x2x128xf32> to vector<1x128xf32>
    %14 = vector.shape_cast %13 : vector<1x128xf32> to vector<1x1x1x128xf32>
    %15 = arith.addf %11, %14 : vector<1x1x1x128xf32>
    %c0_21 = arith.constant 0 : index
    %c0_22 = arith.constant 0 : index
    %c0_23 = arith.constant 0 : index
    %c0_24 = arith.constant 0 : index
    %16 = vector.load %arg6[%c0_21, %c0_22, %c0_23, %c0_24] : memref<1x1x1x128xf32, #tpu.memory_space<vmem>>, vector<1x1x1x128xf32>
    tpu.vector_store %arg6[%c0_21, %c0_22, %c0_23, %c0_24], %15 {strides = array<i32>} : memref<1x1x1x128xf32, #tpu.memory_space<vmem>>, vector<1x1x1x128xf32>,
    return
  }
  func.func @transform_0(%arg0: i32, %arg1: i32, %arg2: i32) -> (i32, i32, i32, i32) {
    %c1_i32 = arith.constant 1 : i32
    %0 = arith.muli %arg1, %c1_i32 : i32
    %1 = arith.addi %0, %arg2 : i32
    %c0_i32 = arith.constant 0 : i32
    %c0_i32_0 = arith.constant 0 : i32
    %c0_i32_1 = arith.constant 0 : i32
    return %arg0, %c0_i32, %1, %c0_i32_0 : i32, i32, i32, i32
  }
  func.func @transform_1(%arg0: i32, %arg1: i32, %arg2: i32) -> (i32, i32, i32, i32) {
    %c1_i32 = arith.constant 1 : i32
    %0 = arith.muli %arg1, %c1_i32 : i32
    %1 = arith.addi %0, %arg2 : i32
    %c0_i32 = arith.constant 0 : i32
    %c0_i32_0 = arith.constant 0 : i32
    %c0_i32_1 = arith.constant 0 : i32
    return %arg0, %c0_i32, %1, %c0_i32_0 : i32, i32, i32, i32
  }
  func.func @transform_2(%arg0: i32, %arg1: i32, %arg2: i32) -> (i32, i32, i32, i32) {
    %c0_i32 = arith.constant 0 : i32
    %c0_i32_0 = arith.constant 0 : i32
    %c0_i32_1 = arith.constant 0 : i32
    return %arg0, %arg1, %c0_i32, %c0_i32_0 : i32, i32, i32, i32
  }
  func.func @transform_3(%arg0: i32, %arg1: i32, %arg2: i32) -> (i32, i32, i32, i32) {
    %c0_i32 = arith.constant 0 : i32
    %c0_i32_0 = arith.constant 0 : i32
    %c0_i32_1 = arith.constant 0 : i32
    return %arg0, %arg1, %c0_i32, %c0_i32_0 : i32, i32, i32, i32
  }
}

</mosaic_0001>

<bundles_post_ra>
// kernel: tpu_custom_call.1
= control target key start
LH: loop header
LB: loop body
LE: loop exit
PB: predicated region body
PF: predicated region fallthrough
CT: control target
= control target key end

     0   :  { %9 = vsyncpa [#allocation3], 0  ;;  %s1084_s0 = inlined_call_operand.hbm [shape: f32[2,4,2,128], index: 0, kind: input, shape index: {}]   ;;  %s1085_s1 = inlined_call_operand.hbm [shape: f32[2,4,2,128], index: 1, kind: input, shape index: {}]   ;;  %s1086_s2 = inlined_call_operand.hbm [shape: f32[2,1,1,128], index: 2, kind: output, shape index: {0}]   ;;  %s1087_s3 = inlined_call_operand.hbm [shape: f32[2,1,1,128], index: 3, kind: output, shape index: {1}]  }
   0x1   :  { %11 = vsyncpa [#allocation3 + $0x1], 0 }
   0x2   :  { %12 = vsyncpa [#allocation6], 0 }
   0x3   :  { %14 = vsyncpa [#allocation6 + $0x1], 0 }
   0x4   :  { %15 = vsyncpa [#allocation4], 0 }
   0x5   :  { %17 = vsyncpa [#allocation4 + $0x1], 0 }
   0x6   :  { %18 = vsyncpa [#allocation9], 0 }
   0x7   :  { %20 = vsyncpa [#allocation9 + $0x1], 0  ;;  %s799_s12 = smov 0   ;;  %s801_s13 = smov 0  }
   0x8   :  { %s803_s14 = smov 0   ;;  %s805_s15 = smov 0  }
   0x9   :  { %s807_s16 = smov 0   ;;  %s809_s17 = smov 0  }
   0xa LB: > { %s498_s18 = sadd.s32 4294967295, %s770_s17   ;;  %s499_s19 = sadd.s32 4294967294, %s770_s17   ;;  %s770_s17 = sphi %s809_s17, %s26_s17   ;;  %s766_s16 = sphi %s807_s16, %s1105_s16   ;;  %s762_s15 = sphi %s805_s15, %s1104_s15   ;;  %s758_s14 = sphi %s803_s14, %s1103_s14   ;;  %s754_s13 = sphi %s801_s13, %s1102_s13   ;;  %s750_s12 = sphi %s799_s12, %s1101_s12  }
   0xb   : > { %s45_s20 = sadd.s32 1, %s766_s16  ;;  %s56_s21 = sadd.s32 1, %s758_s14 }
   0xc   : > { %p47_p0 = scmp.ge.s32.totalorder %s45_s20, 2  ;;  %p63_p1 = scmp.ne.s32.totalorder %s758_s14, %s754_s13 }
   0xd   : > { %p64_p2 = scmp.eq.s32.totalorder %s770_s17, 0  ;;  %p69_p3 = scmp.ne.s32.totalorder %s754_s13, %s750_s12 }
   0xe   : > { %s1107_s20 = smov (%p47_p0, %s45_s20), 0  ;;  %p70_p5 = scmp.eq.s32.totalorder %s498_s18, 0 }
   0xf   : > { %p840_p4 = por %p64_p2, %p63_p1  ;;  %s51_s23 = ssub.s32 %s766_s16, %s1107_s20 }
  0x10   : > { %p125_p6 = scmp.eq.s32.totalorder %s498_s18, 1  ;;  %p54_p7 = scmp.eq.s32.totalorder %s51_s23, 0 }
  0x11   : > { %p846_p8 = por %p70_p5, %p69_p3  ;;  %p131_p10 = scmp.eq.s32.totalorder %s499_s19, 1 }
  0x12   : > { %p850_p9 = por %p125_p6, %p63_p1  ;;  %p539_p13 = scmp.lt.s32.totalorder %s770_s17, 2 }
  0x13   : > { %s1091_s24 = scalar_select %p846_p8, 1, 0 }
  0x14   : > { %s1092_s25 = scalar_select %p850_p9, 1, 0 }
  0x15   : > { %s855_s26 = scalar_select %p54_p7, %s758_s14, %s56_s21  }
  0x16   : > { %p857_p11 = por %p131_p10, %p69_p3  ;;  %s864_s28 = sand.u32 1, %s758_s14  }
  0x17   : > { %s502_s29 = sshll.u32 %s864_s28, 3  ;;  %s515_s30 = sshll.u32 %s766_s16, 7 }
  0x18   : > { %s1093_s27 = scalar_select %p857_p11, 1, 0 }
  0x19   : > { %s873_s6 = scalar_lea.hbm %s1084_s0, %s515_s30  ;;  %s183_s7 = scalar_lea.vmem [#allocation2], %s502_s29 }
  0x1a   : > { %s192_s8 = sshll.u32 %s183_s7, 4  ;;  %p881_p0 = pnand %p539_p13, %p840_p4  ;;  %s877_s8 = int_to_ptr.vmem [resolvable:$true] %s192_s8 }
  0x1b   : > { %s180_s10 = scalar_lea.sflag [#allocation3], %s864_s28  ;;  %s592_s11 = scalar_lea.hbm %s873_s6, 128 }
  0x1c   : > { %p593_p2 = scmp.ne.s32.totalorder %s873_s6, %s592_s11  ;;  %p594_p3 = pneg %p881_p0 }
  0x1d   : > { %s597_s21 = scalar_lea.hbm %s1084_s0, 256  ;;  %p598_p4 = scmp.lt.u32.totalorder %s873_s6, %s1084_s0 }
  0x1e   : > { %p595_p5 = pnand %p594_p3, %p593_p2  ;;  %p599_p7 = scmp.lt.u32.totalorder %s597_s21, %s592_s11 }
  0x1f   : > { %p601_p13 = scmp.lt.u32.totalorder %s592_s11, %s873_s6 }
  0x20   : > { %p596_p6 = pneg %p595_p5  ;;  %p600_p10 = por %p599_p7, %p598_p4 }
  0x22   : > { %p602_p12 = por %p601_p13, %p600_p10 }
  0x24   : > { %p603_p1 = pnand %p602_p12, %p596_p6 }
  0x26   : > { %606 = shalt.err (!%p603_p1)
}
  0x27   : > { %s607_s4 = scalar_lea.vmem %s877_s8, 128  ;;  %s772_s5 = smov [#allocation2]  }
  0x28   : > { %p608_p2 = scmp.ne.s32.totalorder %s877_s8, %s607_s4  ;;  %s612_s7 = sshll.u32 %s772_s5, 4  ;;  %s613_s7 = int_to_ptr.vmem [resolvable:$false] %s612_s7 }
  0x29   : > { %s614_s18 = scalar_lea.vmem %s613_s7, 256  ;;  %p615_p9 = scmp.lt.s32.totalorder %s877_s8, %s613_s7 }
  0x2a   : > { %p610_p5 = pnand %p608_p2, %p594_p3  ;;  %p616_p4 = scmp.lt.s32.totalorder %s614_s18, %s607_s4 }
  0x2c   : > { %p611_p11 = pneg %p610_p5  ;;  %p617_p7 = por %p616_p4, %p615_p9 }
  0x2e   : > { %p618_p10 = pnand %p617_p7, %p611_p11 }
  0x30   : > { %621 = shalt.err (!%p618_p10)
}
  0x31   : > { %s773_s11 = smov 32   ;;  %s774_s19 = smov 2  }
  0x32   : > { %528 = dma.hbm_to_vmem [thread:$0]  (!%p881_p0), %s873_s6, 128, %s877_s8, %s180_s10, %s773_s11, %s773_s11, %s774_s19  }
  0x33   : > { %p223_p9 = scmp.lt.s32.totalorder %s770_s17, 3  ;;  %s923_s23 = scalar_lea.hbm %s1085_s1, %s515_s30 }
  0x34   : > { %p1095_p11 = scmp.ge.s32.totalorder %s770_s17, 1  ;;  %s206_s5 = scalar_lea.vmem [#allocation5], %s502_s29 }
  0x35   : > { %s215_s7 = sshll.u32 %s206_s5, 4  ;;  %s203_s6 = scalar_lea.sflag [#allocation6], %s864_s28  ;;  %s933_s7 = int_to_ptr.vmem [resolvable:$true] %s215_s7 }
  0x36   : > { %p927_p12 = pnand %p1095_p11, %p223_p9  ;;  %s622_s8 = scalar_lea.hbm %s923_s23, 128 }
  0x37   : > { %p623_p1 = scmp.ne.s32.totalorder %s923_s23, %s622_s8  ;;  %s627_s18 = scalar_lea.hbm %s1085_s1, 256 }
  0x38   : > { %p628_p2 = scmp.lt.u32.totalorder %s923_s23, %s1085_s1  ;;  %p629_p5 = scmp.lt.u32.totalorder %s627_s18, %s622_s8 }
  0x39   : > { %p625_p6 = pnand %p623_p1, %p594_p3  ;;  %p631_p7 = scmp.lt.u32.totalorder %s622_s8, %s923_s23 }
  0x3a   : > { %p630_p4 = por %p629_p5, %p628_p2 }
  0x3b   : > { %p626_p13 = pneg %p625_p6 }
  0x3c   : > { %p632_p10 = por %p631_p7, %p630_p4 }
  0x3e   : > { %p633_p9 = pnand %p632_p10, %p626_p13 }
  0x40   : > { %636 = shalt.err (!%p633_p9)
}
  0x41   : > { %s637_s29 = scalar_lea.vmem %s933_s7, 128  ;;  %s775_s5 = smov [#allocation5]  }
  0x42   : > { %p638_p11 = scmp.ne.s32.totalorder %s933_s7, %s637_s29  ;;  %s642_s30 = sshll.u32 %s775_s5, 4  ;;  %s643_s30 = int_to_ptr.vmem [resolvable:$false] %s642_s30 }
  0x43   : > { %s644_s10 = scalar_lea.vmem %s643_s30, 256  ;;  %p645_p8 = scmp.lt.s32.totalorder %s933_s7, %s643_s30 }
  0x44   : > { %p640_p1 = pnand %p638_p11, %p594_p3  ;;  %p646_p2 = scmp.lt.s32.totalorder %s644_s10, %s637_s29 }
  0x46   : > { %p641_p6 = pneg %p640_p1  ;;  %p647_p5 = por %p646_p2, %p645_p8 }
  0x48   : > { %p648_p4 = pnand %p647_p5, %p641_p6 }
  0x4a   : > { %651 = shalt.err (!%p648_p4)
}
  0x4b   : > { %531 = dma.hbm_to_vmem [thread:$0]  (!%p881_p0), %s923_s23, 128, %s933_s7, %s203_s6, %s773_s11, %s773_s11, %s774_s19  }
  0x4c   : > { %227 = sbr.rel (%p927_p12) target bundleno = 150 (0x96), region = 28  ;;  %s967_s8 = sand.u32 (!%p927_p12), 1, %s754_s13  }
  0x4d   : > { %s509_s18 = sshll.u32 (!%p927_p12), %s967_s8, 3  ;;  %s230_s21 = scalar_lea.sflag (!%p927_p12), [#allocation3], %s967_s8 }
  0x4e   : > { %s233_s9 = scalar_lea.vmem (!%p927_p12), [#allocation2], %s509_s18  ;;  %p1097_p8 = scmp.ne.s32.totalorder (!%p927_p12), %s1091_s24, 0 }
  0x53   : > { %733 = dma.done.wait (%p1097_p8), %s230_s21, 128  }
  0x54   : > { %735 = vsyncadd (%p1097_p8), %s230_s21, 4294967168  ;;  %s239_s28 = scalar_lea.sflag [#allocation6], %s967_s8  ;;  %s242_s11 = scalar_lea.vmem [#allocation5], %s509_s18 }
  0x55   : > { %737 = dma.done.wait (%p1097_p8), %s239_s28, 128  }
  0x56   : > { %739 = vsyncadd (%p1097_p8), %s239_s28, 4294967168  ;;  %s981_s19 = scalar_lea.vmem [#allocation7], %s967_s8  ;;  %v776_v0 = vmov 0.0   ;;  %s985_s23 = scalar_lea.vmem [#allocation8], %s967_s8  ;;  %vm294_vm0 = vcmask 1041408  }
  0x57   : > { %279 = vst [vmem:[%s981_s19] sm:$0x1] %v776_v0  ;;  %280 = vst [vmem:[%s985_s23] sm:$0x1] %v776_v0  ;;  %v281_v1 = vld [vmem:[%s233_s9] sm:$0x3]  ;;  %v282_v2 = vld [vmem:[%s233_s9 + $0x2] sm:$0x3] }
  0x58   : > { %v283_v3 = vld [vmem:[%s233_s9 + $0x4] sm:$0x3]  ;;  %v284_v4 = vld [vmem:[%s233_s9 + $0x6] sm:$0x3]  ;;  %v285_v5 = vld [vmem:[%s242_s11] sm:$0x3] }
  0x59   : > { %v286_v6 = vld [vmem:[%s242_s11 + $0x2] sm:$0x3]  ;;  %v287_v7 = vld [vmem:[%s242_s11 + $0x4] sm:$0x3]  ;;  %v288_v8 = vld [vmem:[%s242_s11 + $0x6] sm:$0x3]  ;;  %v290_v9 = vadd.f32 %v285_v5, %v281_v1  ;;  %v311_v11 = vmul.f32 %v285_v5, %v281_v1 }
  0x5a   : > { %v291_v10 = vadd.f32 %v286_v6, %v282_v2  ;;  %v312_v12 = vmul.f32 %v286_v6, %v282_v2  ;;  %v292_v13 = vadd.f32 %v287_v7, %v283_v3  ;;  %v293_v14 = vadd.f32 %v288_v8, %v284_v4  ;;  %s511_s24 = sshll.u32 %s762_s15, 4  ;;  %s348_s4 = sshll.u32 %s981_s19, 4  ;;  %s1006_s4 = int_to_ptr.vmem [resolvable:$true] %s348_s4 }
  0x5b   : > { %v313_v15 = vmul.f32 %v287_v7, %v283_v3  ;;  %v314_v16 = vmul.f32 %v288_v8, %v284_v4  ;;  %v295_v17 = vsel %vm294_vm0, %v290_v9, 0.0  ;;  %v315_v19 = vsel %vm294_vm0, %v311_v11, 0.0  ;;  %s362_s7 = sshll.u32 %s985_s23, 4  ;;  %s1004_s29 = scalar_lea.hbm %s1086_s2, %s511_s24  ;;  %s1013_s7 = int_to_ptr.vmem [resolvable:$true] %s362_s7 }
  0x5c   : > { %v296_v18 = vsel %vm294_vm0, %v291_v10, 0.0  ;;  %v316_v20 = vsel %vm294_vm0, %v312_v12, 0.0  ;;  %v298_v22 = vsel %vm294_vm0, %v292_v13, 0.0  ;;  %v300_v24 = vsel %vm294_vm0, %v293_v14, 0.0  ;;  %s1011_s15 = scalar_lea.hbm %s1087_s3, %s511_s24  ;;  %s331_s10 = scalar_lea.sflag [#allocation4], %s967_s8 }
  0x5d   : > { %v297_v21 = vadd.f32 %v296_v18, %v295_v17  ;;  %v317_v23 = vadd.f32 %v316_v20, %v315_v19  ;;  %v318_v25 = vsel %vm294_vm0, %v313_v15, 0.0  ;;  %v320_v26 = vsel %vm294_vm0, %v314_v16, 0.0  ;;  %s652_s18 = scalar_lea.vmem %s1006_s4, 16  ;;  %p1098_p3 = scmp.ne.s32.totalorder %s1092_s25, 0 }
  0x5e   : > { %v289_v41 = vld [vmem:[%s981_s19] sm:$0x1]  ;;  %p653_p0 = scmp.ne.s32.totalorder %s1006_s4, %s652_s18  ;;  %s777_s21 = smov [#allocation7]  }
  0x5f   : > { %v299_v27 = vadd.f32 %v298_v22, %v297_v21  ;;  %v319_v28 = vadd.f32 %v318_v25, %v317_v23  ;;  %v310_v42 = vld [vmem:[%s985_s23] sm:$0x1]  ;;  %s656_s9 = sshll.u32 %s777_s21, 4  ;;  %s657_s9 = int_to_ptr.vmem [resolvable:$false] %s656_s9 }
  0x60   : > { %p654_p12 = pnand %p653_p0, %p1098_p3  ;;  %s658_s28 = scalar_lea.vmem %s657_s9, 32 }
  0x61   : > { %v301_v29 = vadd.f32 %v300_v24, %v299_v27  ;;  %v321_v30 = vadd.f32 %v320_v26, %v319_v28  ;;  %p659_p7 = scmp.lt.s32.totalorder %s1006_s4, %s657_s9  ;;  %p660_p10 = scmp.lt.s32.totalorder %s658_s28, %s652_s18 }
  0x62   : > { %p655_p13 = pneg %p654_p12 }
  0x63   : > { %v302_v31 = vrot.slane %v301_v29, 4  ;;  %v322_v32 = vrot.slane %v321_v30, 4  ;;  %p661_p9 = por %p660_p10, %p659_p7 }
  0x65   : > { %v303_v33 = vadd.f32 %v302_v31, %v301_v29  ;;  %v323_v34 = vadd.f32 %v322_v32, %v321_v30  ;;  %p662_p11 = pnand %p661_p9, %p655_p13 }
  0x67   : > { %v304_v35 = vrot.slane %v303_v33, 2  ;;  %v324_v36 = vrot.slane %v323_v34, 2 }
  0x69   : > { %v305_v37 = vadd.f32 %v304_v35, %v303_v33  ;;  %v325_v38 = vadd.f32 %v324_v36, %v323_v34 }
  0x6b   : > { %v306_v39 = vrot.slane %v305_v37, 1  ;;  %v326_v40 = vrot.slane %v325_v38, 1 }
  0x6d   : > { %v307_v43 = vadd.f32 %v306_v39, %v305_v37  ;;  %v327_v44 = vadd.f32 %v326_v40, %v325_v38 }
  0x6f   : > { %v308_v45 = vadd.f32 %v307_v43, %v289_v41  ;;  %v328_v46 = vadd.f32 %v327_v44, %v310_v42 }
  0x71   : > { %309 = vst [vmem:[%s981_s19] sm:$0x1] %v308_v45  ;;  %329 = vst [vmem:[%s985_s23] sm:$0x1] %v328_v46 }
  0x72   : > { %665 = shalt.err (!%p662_p11)
}
  0x73   : > { %s666_s11 = scalar_lea.hbm %s1004_s29, 16  ;;  %s670_s24 = scalar_lea.hbm %s1086_s2, 32 }
  0x74   : > { %p667_p1 = scmp.ne.s32.totalorder %s1004_s29, %s666_s11  ;;  %p671_p5 = scmp.lt.u32.totalorder %s1004_s29, %s1086_s2 }
  0x75   : > { %p672_p4 = scmp.lt.u32.totalorder %s670_s24, %s666_s11  ;;  %p674_p0 = scmp.lt.u32.totalorder %s666_s11, %s1004_s29 }
  0x76   : > { %p668_p6 = pnand %p667_p1, %p1098_p3 }
  0x77   : > { %p673_p8 = por %p672_p4, %p671_p5 }
  0x78   : > { %p669_p2 = pneg %p668_p6 }
  0x79   : > { %p675_p12 = por %p674_p0, %p673_p8 }
  0x7b   : > { %p676_p13 = pnand %p675_p12, %p669_p2 }
  0x7d   : > { %679 = shalt.err (!%p676_p13)
}
  0x7e   : > { %521 = dma.vmem_to_hbm [thread:$0]  (%p1098_p3), %s1006_s4, 16, %s1004_s29, %s331_s10  }
  0x7f   : > { %s335_s5 = scalar_lea.sflag [#allocation9], %s967_s8  ;;  %s680_s30 = scalar_lea.vmem %s1013_s7, 16 }
  0x80   : > { %p681_p7 = scmp.ne.s32.totalorder %s1013_s7, %s680_s30  ;;  %s778_s18 = smov [#allocation8]  }
  0x81   : > { %s684_s21 = sshll.u32 %s778_s18, 4  ;;  %s685_s21 = int_to_ptr.vmem [resolvable:$false] %s684_s21 }
  0x82   : > { %p682_p10 = pnand %p681_p7, %p1098_p3  ;;  %s686_s9 = scalar_lea.vmem %s685_s21, 32 }
  0x83   : > { %p687_p11 = scmp.lt.s32.totalorder %s1013_s7, %s685_s21  ;;  %p688_p1 = scmp.lt.s32.totalorder %s686_s9, %s680_s30 }
  0x84   : > { %p683_p9 = pneg %p682_p10 }
  0x85   : > { %p689_p6 = por %p688_p1, %p687_p11 }
  0x87   : > { %p690_p2 = pnand %p689_p6, %p683_p9 }
  0x89   : > { %693 = shalt.err (!%p690_p2)
}
  0x8a   : > { %s694_s8 = scalar_lea.hbm %s1011_s15, 16  ;;  %s698_s10 = scalar_lea.hbm %s1087_s3, 32 }
  0x8b   : > { %p695_p5 = scmp.ne.s32.totalorder %s1011_s15, %s694_s8  ;;  %p699_p0 = scmp.lt.u32.totalorder %s1011_s15, %s1087_s3 }
  0x8c   : > { %p700_p12 = scmp.lt.u32.totalorder %s698_s10, %s694_s8  ;;  %p702_p7 = scmp.lt.u32.totalorder %s694_s8, %s1011_s15 }
  0x8d   : > { %p696_p4 = pnand %p695_p5, %p1098_p3 }
  0x8e   : > { %p701_p13 = por %p700_p12, %p699_p0 }
  0x8f   : > { %p697_p8 = pneg %p696_p4 }
  0x90   : > { %p703_p10 = por %p702_p7, %p701_p13 }
  0x92   : > { %p704_p9 = pnand %p703_p10, %p697_p8 }
  0x94   : > { %707 = shalt.err (!%p704_p9)
}
  0x95   : > { %522 = dma.vmem_to_hbm [thread:$0]  (%p1098_p3), %s1013_s7, 16, %s1011_s15, %s335_s5  }
  0x96 PF: > { %s374_s19 = sand.u32 1, %s750_s12   ;;  %p1099_p11 = scmp.ne.s32.totalorder %s1093_s27, 0 }
  0x97   : > { %p1100_p1 = scmp.ge.s32.totalorder %s770_s17, 2  ;;  %s375_s23 = scalar_lea.sflag [#allocation4], %s374_s19 }
  0x99   : > { %p533_p6 = pnand %p1100_p1, %p1099_p11 }
  0x9b   : > { %741 = dma.done.wait (!%p533_p6), %s375_s23, 16  }
  0x9c   : > { %743 = vsyncadd (!%p533_p6), %s375_s23, 4294967280  ;;  %s383_s24 = scalar_lea.sflag [#allocation9], %s374_s19 }
  0x9d   : > { %745 = dma.done.wait (!%p533_p6), %s383_s24, 16  }
  0x9e   : > { %747 = vsyncadd (!%p533_p6), %s383_s24, 4294967280  ;;  %s26_s17 = sadd.s32 1, %s770_s17   ;;  %s1101_s12 = smov %s754_s13 }
  0x9f   : > { %p23_p2 = scmp.ge.s32.totalorder %s26_s17, 4   ;;  %s1102_s13 = smov %s758_s14 }
  0xa0   : > { %s1103_s14 = smov %s855_s26  ;;  %s1104_s15 = smov %s766_s16 }
  0xa1   : > { %s1105_s16 = smov %s1107_s20  ;;  %25 = sbr.rel (!%p23_p2) target bundleno = 10 (0xa), region = 107 }
  0xa8   :  { %387 = vsyncpa [#allocation3], 1 }
  0xa9   :  { %389 = vsyncpa [#allocation3 + $0x1], 1 }
  0xaa   :  { %390 = vsyncpa [#allocation6], 1 }
  0xab   :  { %392 = vsyncpa [#allocation6 + $0x1], 1 }
  0xac   :  { %393 = vsyncpa [#allocation4], 1 }
  0xad   :  { %395 = vsyncpa [#allocation4 + $0x1], 1 }
  0xae   :  { %396 = vsyncpa [#allocation9], 1 }
  0xaf   :  { %398 = vsyncpa [#allocation9 + $0x1], 1 }

</bundles_post_ra>
